<compile_context>
chip_gen: v5e
topology: v5e:2x2
jax: 0.10.0
libtpu: 0.0.40
codegen_flags: <defaults>
</compile_context>

<pallas_src>
import math
import functools

import jax
import jax.numpy as jnp
from jax.experimental import pallas as pl
from jax.experimental.pallas import tpu as pltpu


def _round_up(x, m):
    return ((x + m - 1) // m) * m


# Tile caps (256-multiples -> fill the 2x256x256 MXUs on v6e/v7x; also fine
# as 128-multiples on v5e's 4x128x128 MXUs).
_TM_CAP = 256
_TN_CAP = 1024
_TK_CAP = 2048
_VMEM_CAP_BYTES = 48 * 1024 * 1024   # safe on v7x (64 MiB physical)


def _pick_nk_tiles(n, k):
    """Weight-side tiles; depend only on (N, K) so params can be prepared once."""
    tn = min(_TN_CAP, _round_up(n, 128))
    tk = min(_TK_CAP, _round_up(k, 128))
    return tn, tk


def _linear_kernel(x_ref, w_ref, b_ref, o_ref):
    # x_ref: (tm, tk)  w_ref: (tk, tn)  b_ref: (1, tn)  o_ref: (tm, tn) f32
    k = pl.program_id(2)

    @pl.when(k == 0)
    def _():
        o_ref[...] = jnp.zeros_like(o_ref)

    # Canonical MXU path: (tm, tk) x (tk, tn), f32 accumulation into the
    # resident output block (output index_map is constant along k).
    o_ref[...] += jnp.dot(x_ref[...], w_ref[...],
                          preferred_element_type=jnp.float32)

    @pl.when(k == pl.num_programs(2) - 1)
    def _():
        o_ref[...] += b_ref[...]


@functools.partial(jax.jit, static_argnames=("out_features", "in_features"))
def my_linear(x, w_kn, b_row, *, out_features, in_features):
    """Pallas equivalent of torch.nn.functional.linear(x, weight, bias).

    x:     (batch, in_features)      float32 activations
    w_kn:  (Kp, Np)                  weight already transposed to (K, N),
                                     padded to tile multiples (prepare_params)
    b_row: (1, Np)                   bias padded to Np, float32
    returns (batch, out_features)    float32
    """
    M, K = x.shape
    assert K == in_features, "in_features mismatch"
    Kp, Np = w_kn.shape

    # Re-derive the same (tn, tk) used by prepare_params; Kp % tk == Np % tn == 0.
    tn = min(_TN_CAP, Np)
    tk = min(_TK_CAP, Kp)
    tm = min(_TM_CAP, _round_up(M, 8))
    Mp = _round_up(M, tm)

    compute_dtype = w_kn.dtype
    in_itemsize = jnp.dtype(compute_dtype).itemsize

    x_p = x if (Mp == M and Kp == K) else jnp.pad(x, ((0, Mp - M), (0, Kp - K)))
    x_p = x_p.astype(compute_dtype)

    grid = (Mp // tm, Np // tn, Kp // tk)

    # Double-buffered inputs + double-buffered resident f32 output + bias.
    vmem_usage = (2 * (tm * tk + tk * tn)) * in_itemsize \
        + 2 * tm * tn * 4 + 2 * tn * 4
    vmem_limit = int(min(_VMEM_CAP_BYTES,
                         max(2 * vmem_usage, 32 * 1024 * 1024)))

    out_p = pl.pallas_call(
        _linear_kernel,
        out_shape=jax.ShapeDtypeStruct((Mp, Np), jnp.float32),
        grid_spec=pltpu.PrefetchScalarGridSpec(
            num_scalar_prefetch=0,
            grid=grid,
            in_specs=[
                pl.BlockSpec((tm, tk), lambda i, j, k: (i, k)),   # x tile
                pl.BlockSpec((tk, tn), lambda i, j, k: (k, j)),   # weight (K, N) tile
                pl.BlockSpec((1, tn), lambda i, j, k: (0, j)),    # bias tile
            ],
            out_specs=pl.BlockSpec((tm, tn), lambda i, j, k: (i, j)),
        ),
        compiler_params=pltpu.CompilerParams(
            dimension_semantics=("parallel", "parallel", "arbitrary"),
            vmem_limit_bytes=vmem_limit,
        ),
        cost_estimate=pl.CostEstimate(
            flops=2 * Mp * Np * Kp,
            # x is re-read Np/tn times, W is re-read Mp/tm times under this grid.
            bytes_accessed=(Mp * Kp * (Np // tn) + Kp * Np * (Mp // tm)) * in_itemsize
                           + (Mp * Np + Np) * 4,
            transcendentals=0,
        ),
    )(x_p, w_kn, b_row)

    return out_p[:M, :out_features]


def prepare_params(weight, bias, *, compute_dtype=jnp.float32):
    """One-off parameter prep (hoisted out of the forward pass).

    weight: (out_features, in_features)  PyTorch layout
    bias:   (out_features,)
    Returns the (K, N)-transposed, tile-padded weight and the padded bias row.
    Set compute_dtype=jnp.bfloat16 for the MXU-native path (accumulation stays
    f32; numerics differ slightly from the f32 PyTorch reference).
    """
    n, k = weight.shape
    tn, tk = _pick_nk_tiles(n, k)
    Np = _round_up(n, tn)
    Kp = _round_up(k, tk)

    w_kn = weight.T                                   # (K, N), MXU-canonical
    if (Kp, Np) != (k, n):
        w_kn = jnp.pad(w_kn, ((0, Kp - k), (0, Np - n)))
    w_kn = w_kn.astype(compute_dtype)

    b_row = bias if Np == n else jnp.pad(bias, (0, Np - n))
    b_row = b_row.reshape(1, Np).astype(jnp.float32)

    return {"w_kn": w_kn, "b_row": b_row,
            "out_features": n, "in_features": k}


def init_params(key, in_features, out_features):
    """Deterministic init matching MyLinear.rest_parameters() semantics."""
    kw, kb = jax.random.split(key)
    # kaiming_uniform_ with a=sqrt(6): gain = sqrt(2 / (1 + a^2)) = sqrt(2/7)
    fan_in = in_features
    gain = math.sqrt(2.0 / (1.0 + 6.0))
    w_bound = gain * math.sqrt(3.0 / fan_in)
    weight = jax.random.uniform(
        kw, (out_features, in_features), jnp.float32, -w_bound, w_bound)
    # bias ~ U(-1/sqrt(fan_in), 1/sqrt(fan_in))
    b_bound = 1.0 / math.sqrt(fan_in)
    bias = jax.random.uniform(
        kb, (out_features,), jnp.float32, -b_bound, b_bound)
    return weight, bias


if __name__ == "__main__":
    key = jax.random.PRNGKey(0)
    k_x, k_p = jax.random.split(key)

    batch, in_features, out_features = 8, 32, 64
    x = jax.random.normal(k_x, (batch, in_features), jnp.float32)
    weight, bias = init_params(k_p, in_features, out_features)

    # One-off transpose/pad of the reused parameters (not part of the forward).
    params = prepare_params(weight, bias)

    y = my_linear(x, params["w_kn"], params["b_row"],
                  out_features=params["out_features"],
                  in_features=params["in_features"])
    jax.block_until_ready(y)

    # Correctness check against plain JAX reference (y = x @ W^T + b).
    # TPU default matmul precision is not bit-exact f32; tolerance documented.
    y_ref = x @ weight.T + bias
    assert y.shape == (batch, out_features)
    assert jnp.allclose(y, y_ref, atol=1e-4, rtol=1e-4)

    print("KERNEL_OK")
</pallas_src>

<mosaic_0001>
module attributes {stable_mosaic.version = 11 : i64} {
  func.func @_linear_kernel(%arg0: i32, %arg1: i32, %arg2: i32, %arg3: memref<8x128xf32, #tpu.memory_space<vmem>>, %arg4: memref<128x128xf32, #tpu.memory_space<vmem>>, %arg5: memref<1x128xf32, #tpu.memory_space<vmem>>, %arg6: memref<8x128xf32, #tpu.memory_space<vmem>>) attributes {dimension_semantics = [#tpu.dimension_semantics<parallel>, #tpu.dimension_semantics<parallel>, #tpu.dimension_semantics<arbitrary>], iteration_bounds = array<i64: 1, 1, 1>, scalar_prefetch = 0 : i64, scratch_operands = 0 : i64, tpu.core_type = #tpu.core_type<tc>, window_params = [{transform_indices = @transform_0, window_bounds = array<i64: 8, 128>}, {transform_indices = @transform_1, window_bounds = array<i64: 128, 128>}, {transform_indices = @transform_2, window_bounds = array<i64: 1, 128>}, {transform_indices = @transform_3, window_bounds = array<i64: 8, 128>}]} {
    %c0_i32 = arith.constant 0 : i32
    %0 = arith.cmpi eq, %arg2, %c0_i32 : i32
    %1 = arith.extui %0 : i1 to i32
    %c0_i32_0 = arith.constant 0 : i32
    %2 = arith.cmpi ne, %1, %c0_i32_0 : i32
    scf.if %2 {
      %cst_10 = arith.constant 0.000000e+00 : f32
      %12 = vector.broadcast %cst_10 : f32 to vector<8x128xf32>
      %c0_11 = arith.constant 0 : index
      %c0_12 = arith.constant 0 : index
      %13 = vector.load %arg6[%c0_11, %c0_12] : memref<8x128xf32, #tpu.memory_space<vmem>>, vector<8x128xf32>
      tpu.vector_store %arg6[%c0_11, %c0_12], %12 {strides = array<i32>} : memref<8x128xf32, #tpu.memory_space<vmem>>, vector<8x128xf32>,
    } else {
    }
    %c0 = arith.constant 0 : index
    %c0_1 = arith.constant 0 : index
    %3 = vector.load %arg6[%c0, %c0_1] : memref<8x128xf32, #tpu.memory_space<vmem>>, vector<8x128xf32>
    %c0_2 = arith.constant 0 : index
    %c0_3 = arith.constant 0 : index
    %4 = vector.load %arg3[%c0_2, %c0_3] : memref<8x128xf32, #tpu.memory_space<vmem>>, vector<8x128xf32>
    %c0_4 = arith.constant 0 : index
    %c0_5 = arith.constant 0 : index
    %5 = vector.load %arg4[%c0_4, %c0_5] : memref<128x128xf32, #tpu.memory_space<vmem>>, vector<128x128xf32>
    %cst = arith.constant dense<0.000000e+00> : vector<8x128xf32>
    %6 = tpu.matmul %4, %5, %cst {dimension_numbers = #tpu.dot_dimension_numbers<[1], [0], [0], [1], [0, 0, 1, 1], [], []>} : vector<8x128xf32>, vector<128x128xf32>, vector<8x128xf32> -> vector<8x128xf32>
    %7 = arith.addf %3, %6 : vector<8x128xf32>
    %c0_6 = arith.constant 0 : index
    %c0_7 = arith.constant 0 : index
    %8 = vector.load %arg6[%c0_6, %c0_7] : memref<8x128xf32, #tpu.memory_space<vmem>>, vector<8x128xf32>
    tpu.vector_store %arg6[%c0_6, %c0_7], %7 {strides = array<i32>} : memref<8x128xf32, #tpu.memory_space<vmem>>, vector<8x128xf32>,
    %c0_i32_8 = arith.constant 0 : i32
    %9 = arith.cmpi eq, %arg2, %c0_i32_8 : i32
    %10 = arith.extui %9 : i1 to i32
    %c0_i32_9 = arith.constant 0 : i32
    %11 = arith.cmpi ne, %10, %c0_i32_9 : i32
    scf.if %11 {
      %c0_10 = arith.constant 0 : index
      %c0_11 = arith.constant 0 : index
      %12 = vector.load %arg6[%c0_10, %c0_11] : memref<8x128xf32, #tpu.memory_space<vmem>>, vector<8x128xf32>
      %c0_12 = arith.constant 0 : index
      %c0_13 = arith.constant 0 : index
      %13 = vector.load %arg5[%c0_12, %c0_13] : memref<1x128xf32, #tpu.memory_space<vmem>>, vector<1x128xf32>
      %14 = vector.broadcast %13 : vector<1x128xf32> to vector<8x128xf32>
      %15 = arith.addf %12, %14 : vector<8x128xf32>
      %c0_14 = arith.constant 0 : index
      %c0_15 = arith.constant 0 : index
      %16 = vector.load %arg6[%c0_14, %c0_15] : memref<8x128xf32, #tpu.memory_space<vmem>>, vector<8x128xf32>
      tpu.vector_store %arg6[%c0_14, %c0_15], %15 {strides = array<i32>} : memref<8x128xf32, #tpu.memory_space<vmem>>, vector<8x128xf32>,
    } else {
    }
    return
  }
  func.func @transform_0(%arg0: i32, %arg1: i32, %arg2: i32) -> (i32, i32) {
    %c0_i32 = arith.constant 0 : i32
    return %arg0, %arg2 : i32, i32
  }
  func.func @transform_1(%arg0: i32, %arg1: i32, %arg2: i32) -> (i32, i32) {
    %c0_i32 = arith.constant 0 : i32
    return %arg2, %arg1 : i32, i32
  }
  func.func @transform_2(%arg0: i32, %arg1: i32, %arg2: i32) -> (i32, i32) {
    %c0_i32 = arith.constant 0 : i32
    %c0_i32_0 = arith.constant 0 : i32
    return %c0_i32, %arg1 : i32, i32
  }
  func.func @transform_3(%arg0: i32, %arg1: i32, %arg2: i32) -> (i32, i32) {
    %c0_i32 = arith.constant 0 : i32
    return %arg0, %arg1 : i32, i32
  }
}

</mosaic_0001>

<bundles_post_ra>
// kernel: my_linear.1
= control target key start
LH: loop header
LB: loop body
LE: loop exit
PB: predicated region body
PF: predicated region fallthrough
CT: control target
= control target key end

     0   :  { %8 = vsyncpa [#allocation3], 0  ;;  %s197_s0 = inlined_call_operand.vmem [shape: f32[8,128], index: 0, kind: input, shape index: {}]   ;;  %s198_s1 = inlined_call_operand.hbm [shape: f32[128,128], index: 1, kind: input, shape index: {}]   ;;  %s199_s2 = inlined_call_operand.vmem [shape: f32[1,128], index: 2, kind: input, shape index: {}]   ;;  %s200_s3 = inlined_call_operand.hbm [shape: f32[8,128], index: 3, kind: output, shape index: {}]  }
   0x1   :  { %9 = vsyncpa [#allocation4], 0  ;;  %s16_s14 = sshll.u32 %s198_s1, 4  ;;  %s161_s15 = smov [#allocation2]   ;;  %s17_s14 = int_to_ptr.hbm [resolvable:$true] %s16_s14 }
   0x2   :  { %s18_s16 = sshll.u32 %s161_s15, 4  ;;  %s162_s17 = smov 128   ;;  %s19_s16 = int_to_ptr.vmem [resolvable:$true] %s18_s16 }
   0x3   :  { %s163_s18 = smov 8  }
   0x4   :  { %24 = dma.hbm_to_vmem [thread:$0]  %s17_s14, 2048, %s19_s16, [#allocation3], %s162_s17, %s162_s17, %s163_s18  }
   0x5   :  { %157 = dma.done.wait [#allocation3], 2048  }
   0x6   :  { %158 = vsyncadd [#allocation3], 4294965248  ;;  %v53_v0 = vld [vmem:[#allocation2 + $0x78] sm:$0xff]  ;;  %v52_v1 = vld [vmem:[#allocation2 + $0x70] sm:$0xff]  ;;  %s164_s22 = smov [#allocation5]   ;;  %s93_s26 = sshll.u32 %s200_s3, 4  ;;  %s94_s26 = int_to_ptr.hbm [resolvable:$true] %s93_s26 }
   0x7   :  { %54 = vmatpush.msra.mxu0 %v53_v0  ;;  %v51_v2 = vld [vmem:[#allocation2 + $0x68] sm:$0xff]  ;;  %v50_v3 = vld [vmem:[#allocation2 + $0x60] sm:$0xff]  ;;  %v49_v4 = vld [vmem:[#allocation2 + $0x58] sm:$0xff]  ;;  %s91_s23 = sshll.u32 %s164_s22, 4  ;;  %s92_s23 = int_to_ptr.vmem [resolvable:$true] %s91_s23 }
   0x8   :  { %v48_v5 = vld [vmem:[#allocation2 + $0x50] sm:$0xff]  ;;  %v47_v6 = vld [vmem:[#allocation2 + $0x48] sm:$0xff]  ;;  %v46_v7 = vld [vmem:[#allocation2 + $0x40] sm:$0xff] }
   0x9   :  { %55 = vmatpush.msra.mxu0 %v52_v1  ;;  %v45_v8 = vld [vmem:[#allocation2 + $0x38] sm:$0xff]  ;;  %v44_v9 = vld [vmem:[#allocation2 + $0x30] sm:$0xff]  ;;  %v43_v10 = vld [vmem:[#allocation2 + $0x28] sm:$0xff] }
   0xa   :  { %v42_v11 = vld [vmem:[#allocation2 + $0x20] sm:$0xff]  ;;  %v41_v12 = vld [vmem:[#allocation2 + $0x18] sm:$0xff]  ;;  %v40_v13 = vld [vmem:[#allocation2 + $0x10] sm:$0xff] }
   0xb   :  { %56 = vmatpush.msra.mxu0 %v51_v2  ;;  %v39_v14 = vld [vmem:[#allocation2 + $0x8] sm:$0xff]  ;;  %v38_v15 = vld [vmem:[#allocation2] sm:$0xff] }
   0xc   :  { %v37_v16 = vld [vmem:[%s197_s0] sm:$0xff] }
   0xd   :  { %57 = vmatpush.msra.mxu0 %v50_v3  ;;  %v108_v17 = vld [vmem:[%s199_s2] ss:$0 sm:$0xff] }
   0xf   :  { %58 = vmatpush.msra.mxu0 %v49_v4 }
  0x11   :  { %59 = vmatpush.msra.mxu0 %v48_v5 }
  0x13   :  { %60 = vmatpush.msra.mxu0 %v47_v6 }
  0x15   :  { %61 = vmatpush.msra.mxu0 %v46_v7 }
  0x17   :  { %62 = vmatpush.msra.mxu0 %v45_v8 }
  0x19   :  { %63 = vmatpush.msra.mxu0 %v44_v9 }
  0x1b   :  { %64 = vmatpush.msra.mxu0 %v43_v10 }
  0x1d   :  { %65 = vmatpush.msra.mxu0 %v42_v11 }
  0x1f   :  { %66 = vmatpush.msra.mxu0 %v41_v12 }
  0x21   :  { %67 = vmatpush.msra.mxu0 %v40_v13 }
  0x23   :  { %68 = vmatpush.msra.mxu0 %v39_v14 }
  0x25   :  { %69 = vmatpush.msra.mxu0 %v38_v15 }
  0x26   :  { %70 = vmatmul.f32.vlgmr.msra.gmra.mxu0 %v37_v16 }
  0xa3   :  { %v71_v18 = vpop.f32.mrf.mxu0 }
  0xa4   :  { %v84_v19 = vadd.f32 %v108_v17, %v71_v18 }
  0xa6   :  { %85 = vst [vmem:[#allocation5] sm:$0xff] %v84_v19 }
  0xa7   :  { %96 = dma.vmem_to_hbm [thread:$0]  %s92_s23, 128, %s94_s26, [#allocation4]  }
  0xa8   :  { %159 = dma.done.wait [#allocation4], 128  }
  0xa9   :  { %160 = vsyncadd [#allocation4], 4294967168 }
  0xaa   :  { %101 = vsyncpa [#allocation3], 1 }
  0xab   :  { %102 = vsyncpa [#allocation4], 1 }

</bundles_post_ra>
